<compile_context>
chip_gen: v6e
topology: v6e:2x2x1
jax: 0.10.0
libtpu: 0.0.40
codegen_flags: <defaults>
</compile_context>

<pallas_src>
import jax
import jax.numpy as jnp
from jax import lax
from jax.experimental import pallas as pl
from jax.experimental.pallas import tpu as pltpu

D_MODEL = 256      # fixed by the module: nn.Linear(256, output)
LANE = 128
SUBLANE = 8
MAX_TILE_N = 512   # rows per N tile: x tile = 512*256*4B = 512 KiB -> fits the scoped
                   # VMEM budget of v5e/v6e/v7x with double buffering to spare.


def _round_up(a, b):
    return (a + b - 1) // b * b


def _scaled_matmul(x, w, x_col_ssq):
    """out = x @ (column-normalized W.T) with both L2 norms folded into W.

    x:          (tn, 256)   f32 tile of the batch
    w:          (o_pad, 256) f32 weight in torch nn.Linear layout (zero-padded rows OK)
    x_col_ssq:  (1, 256)    f32 FULL-batch per-column sum of squares of x
    """
    # rsqrt on the tiny norm vectors (EUP); guarded so an all-zero x column or a
    # zero-padded weight row yields 0 instead of inf/NaN (PyTorch would emit NaN
    # in that degenerate case; non-degenerate results are identical).
    inv_nx = jnp.where(x_col_ssq > 0.0, lax.rsqrt(x_col_ssq), 0.0)    # (1, 256)
    w_ssq = jnp.sum(w * w, axis=1, keepdims=True)                     # (o_pad, 1)
    inv_nw = jnp.where(w_ssq > 0.0, lax.rsqrt(w_ssq), 0.0)            # (o_pad, 1)
    w_scaled = w * inv_nw * inv_nx                                    # (o_pad, 256)
    # (tn, 256) x (o_pad, 256)^T on the MXU, f32 accumulate; RHS contracts on its
    # last dim so the weight never needs a transpose anywhere.
    return lax.dot_general(
        x, w_scaled,
        dimension_numbers=(((1,), (1,)), ((), ())),
        preferred_element_type=jnp.float32,
    )


def _fused_kernel(w_ref, x_ref, o_ref):
    # Single-block path (whole batch fits in one VMEM tile): column sum-of-squares
    # and the scaled matmul in one launch.
    x = x_ref[...].astype(jnp.float32)
    w = w_ref[...].astype(jnp.float32)
    x_col_ssq = jnp.sum(x * x, axis=0, keepdims=True)
    o_ref[...] = _scaled_matmul(x, w, x_col_ssq).astype(o_ref.dtype)


def _colsq_kernel(x_ref, ssq_ref):
    # Phase 1: accumulate per-column sum of squares of x across N tiles
    # (full-batch reduction -- must complete before any output tile is computed).
    @pl.when(pl.program_id(0) == 0)
    def _():
        ssq_ref[...] = jnp.zeros_like(ssq_ref)

    x = x_ref[...].astype(jnp.float32)
    ssq_ref[...] += jnp.sum(x * x, axis=0, keepdims=True)


def _matmul_kernel(ssq_ref, w_ref, x_ref, o_ref):
    # Phase 2: stream N tiles through x @ (scaled W). The (o_pad, 256) weight
    # scaling is recomputed per tile (negligible vs. the matmul) so the N axis can
    # be "parallel" (megacore) without any cross-iteration scratch state.
    o_ref[...] = _scaled_matmul(
        x_ref[...].astype(jnp.float32),
        w_ref[...].astype(jnp.float32),
        ssq_ref[...],
    ).astype(o_ref.dtype)


def _cosine_linear(x, weight):
    """x: (N, 256); weight: (output, 256) in torch nn.Linear layout."""
    n, d = x.shape
    out_dim, d_w = weight.shape
    assert d == D_MODEL and d_w == D_MODEL, "CosineLinear expects 256-dim inputs"
    out_dtype = x.dtype

    # Lane-dense output: pad the output dim to a multiple of 128 so stores are
    # full-lane vst (a 32-wide output would force masked partial stores) and the
    # weight tile uses every lane. Sliced back off at the end.
    o_pad = _round_up(out_dim, LANE)
    if o_pad != out_dim:
        weight = jnp.pad(weight, ((0, o_pad - out_dim), (0, 0)))

    # N tiling (pad rows are zeros: they don't perturb the column norms and their
    # output rows are sliced off).
    tile_n = min(MAX_TILE_N, _round_up(n, SUBLANE))
    n_pad = _round_up(n, tile_n)
    if n_pad != n:
        x = jnp.pad(x, ((0, n_pad - n), (0, 0)))
    num_tiles = n_pad // tile_n

    if num_tiles == 1:
        # Small batch: one fused launch, whole-array blocks, no grid.
        out = pl.pallas_call(
            _fused_kernel,
            out_shape=jax.ShapeDtypeStruct((n_pad, o_pad), out_dtype),
            in_specs=[
                pl.BlockSpec((o_pad, D_MODEL), lambda: (0, 0)),
                pl.BlockSpec((n_pad, D_MODEL), lambda: (0, 0)),
            ],
            out_specs=pl.BlockSpec((n_pad, o_pad), lambda: (0, 0)),
        )(weight, x)
    else:
        # Phase 1: full-batch per-column sum of squares. All grid steps accumulate
        # into the same (1, 256) output block -> reduction axis is "arbitrary".
        ssq = pl.pallas_call(
            _colsq_kernel,
            out_shape=jax.ShapeDtypeStruct((1, D_MODEL), jnp.float32),
            grid_spec=pltpu.PrefetchScalarGridSpec(
                num_scalar_prefetch=0,
                grid=(num_tiles,),
                in_specs=[pl.BlockSpec((tile_n, D_MODEL), lambda i: (i, 0))],
                out_specs=pl.BlockSpec((1, D_MODEL), lambda i: (0, 0)),
            ),
            compiler_params=pltpu.CompilerParams(
                dimension_semantics=("arbitrary",)),
        )(x)

        # Phase 2: pipelined matmul over independent N tiles with both norms folded
        # into the weight. (O is a class head and expected small; it is not tiled.)
        out = pl.pallas_call(
            _matmul_kernel,
            out_shape=jax.ShapeDtypeStruct((n_pad, o_pad), out_dtype),
            grid_spec=pltpu.PrefetchScalarGridSpec(
                num_scalar_prefetch=0,
                grid=(num_tiles,),
                in_specs=[
                    pl.BlockSpec((1, D_MODEL), lambda i: (0, 0)),
                    pl.BlockSpec((o_pad, D_MODEL), lambda i: (0, 0)),
                    pl.BlockSpec((tile_n, D_MODEL), lambda i: (i, 0)),
                ],
                out_specs=pl.BlockSpec((tile_n, o_pad), lambda i: (i, 0)),
            ),
            compiler_params=pltpu.CompilerParams(
                dimension_semantics=("parallel",)),
        )(ssq, weight, x)

    return out[:n, :out_dim]


cosine_linear = jax.jit(_cosine_linear)


if __name__ == "__main__":
    key = jax.random.PRNGKey(0)
    kx1, kw1, kx2, kw2 = jax.random.split(key, 4)

    def reference(x, weight):
        # Mirrors the PyTorch forward exactly.
        norm_x = x / jnp.linalg.norm(x, axis=0, keepdims=True)
        wstar = weight.T
        norm_wstar = wstar / jnp.linalg.norm(wstar, axis=0, keepdims=True)
        return norm_x @ norm_wstar

    # Tolerance: the folded-norm / rsqrt refactor is mathematically identical but
    # changes rounding order vs. the literal divide-then-matmul reference.
    ATOL = RTOL = 2e-4

    # Case 1: small shape (single fused launch, padded 32 -> 128 output lanes).
    N1, OUT1 = 8, 32
    x1 = jax.random.normal(kx1, (N1, D_MODEL), dtype=jnp.float32)
    w1 = jax.random.normal(kw1, (OUT1, D_MODEL), dtype=jnp.float32) * 0.05
    out1 = jax.block_until_ready(cosine_linear(x1, w1))
    ref1 = reference(x1, w1)
    assert out1.shape == (N1, OUT1)
    assert jnp.allclose(out1, ref1, atol=ATOL, rtol=RTOL), (
        f"case1 mismatch: max|diff|={jnp.max(jnp.abs(out1 - ref1)):.3e}")

    # Case 2: exercises the two-phase tiled path (N > MAX_TILE_N, padded N and O).
    N2, OUT2 = 520, 200
    x2 = jax.random.normal(kx2, (N2, D_MODEL), dtype=jnp.float32)
    w2 = jax.random.normal(kw2, (OUT2, D_MODEL), dtype=jnp.float32) * 0.05
    out2 = jax.block_until_ready(cosine_linear(x2, w2))
    ref2 = reference(x2, w2)
    assert out2.shape == (N2, OUT2)
    assert jnp.allclose(out2, ref2, atol=ATOL, rtol=RTOL), (
        f"case2 mismatch: max|diff|={jnp.max(jnp.abs(out2 - ref2)):.3e}")

    print("KERNEL_OK")
</pallas_src>

<mosaic_0001>
module attributes {stable_mosaic.version = 11 : i64} {
  func.func @_fused_kernel(%arg0: memref<128x256xf32, #tpu.memory_space<vmem>>, %arg1: memref<8x256xf32, #tpu.memory_space<vmem>>, %arg2: memref<8x128xf32, #tpu.memory_space<vmem>>) attributes {dimension_semantics = [], scalar_prefetch = 0 : i64, scratch_operands = 0 : i64, tpu.core_type = #tpu.core_type<tc>} {
    %c0 = arith.constant 0 : index
    %c0_0 = arith.constant 0 : index
    %0 = vector.load %arg1[%c0, %c0_0] : memref<8x256xf32, #tpu.memory_space<vmem>>, vector<8x256xf32>
    %c0_1 = arith.constant 0 : index
    %c0_2 = arith.constant 0 : index
    %1 = vector.load %arg0[%c0_1, %c0_2] : memref<128x256xf32, #tpu.memory_space<vmem>>, vector<128x256xf32>
    %2 = arith.mulf %0, %0 : vector<8x256xf32>
    %cst = arith.constant dense<0.000000e+00> : vector<256xf32>
    %3 = vector.multi_reduction <add>, %2, %cst [0] : vector<8x256xf32> to vector<256xf32>
    %4 = vector.shape_cast %3 : vector<256xf32> to vector<1x256xf32>
    %cst_3 = arith.constant 0.000000e+00 : f32
    %5 = vector.broadcast %cst_3 : f32 to vector<1x256xf32>
    %6 = arith.cmpf ogt, %4, %5 : vector<1x256xf32>
    %7 = math.rsqrt %4 : vector<1x256xf32>
    %cst_4 = arith.constant 0.000000e+00 : f32
    %8 = vector.broadcast %cst_4 : f32 to vector<1x256xf32>
    %9 = arith.select %6, %7, %8 : vector<1x256xi1>, vector<1x256xf32>
    %10 = arith.mulf %1, %1 : vector<128x256xf32>
    %cst_5 = arith.constant dense<0.000000e+00> : vector<128xf32>
    %11 = vector.multi_reduction <add>, %10, %cst_5 [1] : vector<128x256xf32> to vector<128xf32>
    %12 = vector.shape_cast %11 : vector<128xf32> to vector<128x1xf32>
    %cst_6 = arith.constant 0.000000e+00 : f32
    %13 = vector.broadcast %cst_6 : f32 to vector<128x1xf32>
    %14 = arith.cmpf ogt, %12, %13 : vector<128x1xf32>
    %15 = math.rsqrt %12 : vector<128x1xf32>
    %cst_7 = arith.constant 0.000000e+00 : f32
    %16 = vector.broadcast %cst_7 : f32 to vector<128x1xf32>
    %17 = arith.select %14, %15, %16 : vector<128x1xi1>, vector<128x1xf32>
    %18 = vector.broadcast %17 : vector<128x1xf32> to vector<128x256xf32>
    %19 = arith.mulf %1, %18 : vector<128x256xf32>
    %20 = vector.broadcast %9 : vector<1x256xf32> to vector<128x256xf32>
    %21 = arith.mulf %19, %20 : vector<128x256xf32>
    %cst_8 = arith.constant dense<0.000000e+00> : vector<8x128xf32>
    %22 = tpu.matmul %0, %21, %cst_8 {dimension_numbers = #tpu.dot_dimension_numbers<[1], [1], [0], [0], [0, 0, 1, 0], [], []>} : vector<8x256xf32>, vector<128x256xf32>, vector<8x128xf32> -> vector<8x128xf32>
    %c0_9 = arith.constant 0 : index
    %c0_10 = arith.constant 0 : index
    %23 = vector.load %arg2[%c0_9, %c0_10] : memref<8x128xf32, #tpu.memory_space<vmem>>, vector<8x128xf32>
    tpu.vector_store %arg2[%c0_9, %c0_10], %22 {strides = array<i32>} : memref<8x128xf32, #tpu.memory_space<vmem>>, vector<8x128xf32>,
    return
  }
}

</mosaic_0001>

<bundles_post_ra>
// kernel: _cosine_linear.1
= control target key start
LH: loop header
LB: loop body
LE: loop exit
PB: predicated region body
PF: predicated region fallthrough
CT: control target
= control target key end

     0   :  { %s724_s0 = inlined_call_operand.vmem [shape: f32[128,256], index: 0, kind: input, shape index: {}]   ;;  %s725_s1 = inlined_call_operand.vmem [shape: f32[8,256], index: 1, kind: input, shape index: {}]   ;;  %s726_s2 = inlined_call_operand.hbm [shape: f32[8,128], index: 2, kind: output, shape index: {}]  }
   0x1   :  { %v421_v0 = vld [vmem:[%s724_s0 + $0xf0] sm:$0xff]  ;;  %v426_v1 = vld [vmem:[%s724_s0 + $0xf8] sm:$0xff]  ;;  %v447_v7 = vld [vmem:[%s724_s0 + $0xe0] sm:$0xff] }
   0x2   :  { %v431_v2 = vld [vmem:[%s724_s0 + $0xd0] sm:$0xff]  ;;  %v96_v3 = vmul.f32 %v421_v0, %v421_v0  ;;  %v97_v4 = vmul.f32 %v426_v1, %v426_v1  ;;  %v440_v5 = vld [vmem:[%s724_s0 + $0xd8] sm:$0xff]  ;;  %v452_v8 = vld [vmem:[%s724_s0 + $0xe8] sm:$0xff]  ;;  %v94_v10 = vmul.f32 %v447_v7, %v447_v7 }
   0x3   :  { %v92_v6 = vmul.f32 %v431_v2, %v431_v2  ;;  %v93_v9 = vmul.f32 %v440_v5, %v440_v5  ;;  %v95_v11 = vmul.f32 %v452_v8, %v452_v8  ;;  %v463_v12 = vld [vmem:[%s724_s0 + $0xc0] sm:$0xff]  ;;  %v468_v13 = vld [vmem:[%s724_s0 + $0xc8] sm:$0xff]  ;;  %v473_v14 = vld [vmem:[%s724_s0 + $0xb0] sm:$0xff] }
   0x4   :  { %v143_v15 = vadd.f32 %v97_v4, %v96_v3  ;;  %v90_v16 = vmul.f32 %v463_v12, %v463_v12  ;;  %v91_v17 = vmul.f32 %v468_v13, %v468_v13  ;;  %v482_v18 = vld [vmem:[%s724_s0 + $0xb8] sm:$0xff]  ;;  %v487_v19 = vld [vmem:[%s724_s0 + $0xa0] sm:$0xff]  ;;  %v492_v20 = vld [vmem:[%s724_s0 + $0xa8] sm:$0xff]  ;;  %v88_v23 = vmul.f32 %v473_v14, %v473_v14 }
   0x5   :  { %v137_v21 = vadd.f32 %v93_v9, %v92_v6  ;;  %v140_v22 = vadd.f32 %v95_v11, %v94_v10  ;;  %v89_v24 = vmul.f32 %v482_v18, %v482_v18  ;;  %v86_v26 = vmul.f32 %v487_v19, %v487_v19  ;;  %v505_v28 = vld [vmem:[%s724_s0 + $0x90] sm:$0xff]  ;;  %v510_v29 = vld [vmem:[%s724_s0 + $0x98] sm:$0xff]  ;;  %v515_v30 = vld [vmem:[%s724_s0 + $0x80] sm:$0xff] }
   0x6   :  { %144 = vadd.xlane.f32.xlu0 %v143_v15  ;;  %v134_v25 = vadd.f32 %v91_v17, %v90_v16  ;;  %v87_v27 = vmul.f32 %v492_v20, %v492_v20  ;;  %v520_v31 = vld [vmem:[%s724_s0 + $0x88] sm:$0xff]  ;;  %v84_v33 = vmul.f32 %v505_v28, %v505_v28  ;;  %v85_v34 = vmul.f32 %v510_v29, %v510_v29  ;;  %v533_v38 = vld [vmem:[%s724_s0 + $0x70] sm:$0xff]  ;;  %v538_v39 = vld [vmem:[%s724_s0 + $0x78] sm:$0xff] }
   0x7   :  { %138 = vadd.xlane.f32.xlu1 %v137_v21  ;;  %v131_v32 = vadd.f32 %v89_v24, %v88_v23  ;;  %v82_v36 = vmul.f32 %v515_v30, %v515_v30  ;;  %v83_v37 = vmul.f32 %v520_v31, %v520_v31  ;;  %v13_v40 = vld [vmem:[%s725_s1 + $0x8] sm:$0xff]  ;;  %v546_v41 = vld [vmem:[%s724_s0 + $0x60] sm:$0xff] }
   0x8   :  { %v128_v35 = vadd.f32 %v87_v27, %v86_v26  ;;  %v551_v42 = vld [vmem:[%s724_s0 + $0x68] sm:$0xff]  ;;  %322 = vmatprep.mubr.f32.mxu0 %v13_v40 }
   0xa   :  { %141 = vadd.xlane.f32.xlu0 %v140_v22 }
   0xb   :  { %135 = vadd.xlane.f32.xlu1 %v134_v25 }
   0xc   :  { %7 = vsyncpa [#allocation3], 0  ;;  %v125_v43 = vadd.f32 %v85_v34, %v84_v33  ;;  %v80_v44 = vmul.f32 %v533_v38, %v533_v38  ;;  %v81_v45 = vmul.f32 %v538_v39, %v538_v39  ;;  %v122_v46 = vadd.f32 %v83_v37, %v82_v36  ;;  %v564_v49 = vld [vmem:[%s724_s0 + $0x50] sm:$0xff]  ;;  %v569_v50 = vld [vmem:[%s724_s0 + $0x58] sm:$0xff] }
   0xd   :  { %v78_v47 = vmul.f32 %v546_v41, %v546_v41  ;;  %v79_v48 = vmul.f32 %v551_v42, %v551_v42  ;;  %v574_v51 = vld [vmem:[%s724_s0 + $0x40] sm:$0xff]  ;;  %v579_v52 = vld [vmem:[%s724_s0 + $0x48] sm:$0xff]  ;;  %v76_v54 = vmul.f32 %v564_v49, %v564_v49  ;;  %v77_v55 = vmul.f32 %v569_v50, %v569_v50  ;;  %v592_v59 = vld [vmem:[%s724_s0 + $0x30] sm:$0xff] }
   0xe   :  { %132 = vadd.xlane.f32.xlu0 %v131_v32  ;;  %v119_v53 = vadd.f32 %v81_v45, %v80_v44  ;;  %v74_v57 = vmul.f32 %v574_v51, %v574_v51  ;;  %v75_v58 = vmul.f32 %v579_v52, %v579_v52  ;;  %v597_v60 = vld [vmem:[%s724_s0 + $0x38] sm:$0xff]  ;;  %v602_v61 = vld [vmem:[%s724_s0 + $0x20] sm:$0xff]  ;;  %v607_v62 = vld [vmem:[%s724_s0 + $0x28] sm:$0xff]  ;;  %v72_v3 = vmul.f32 %v592_v59, %v592_v59 }
   0xf   :  { %129 = vadd.xlane.f32.xlu1 %v128_v35  ;;  %v116_v56 = vadd.f32 %v79_v48, %v78_v47  ;;  %v113_v63 = vadd.f32 %v77_v55, %v76_v54  ;;  %v73_v4 = vmul.f32 %v597_v60, %v597_v60  ;;  %v70_v9 = vmul.f32 %v602_v61, %v602_v61  ;;  %v620_v11 = vld [vmem:[%s724_s0 + $0x10] sm:$0xff]  ;;  %v625_v15 = vld [vmem:[%s724_s0 + $0x18] sm:$0xff]  ;;  %v630_v16 = vld [vmem:[%s724_s0] sm:$0xff] }
  0x10   :  { %v110_v6 = vadd.f32 %v75_v58, %v74_v57  ;;  %v71_v10 = vmul.f32 %v607_v62, %v607_v62  ;;  %v635_v17 = vld [vmem:[%s724_s0 + $0x8] sm:$0xff]  ;;  %v68_v22 = vmul.f32 %v620_v11, %v620_v11  ;;  %v69_v23 = vmul.f32 %v625_v15, %v625_v15  ;;  %v648_v33 = vld [vmem:[%s725_s1] sm:$0xff]  ;;  %s402_s1 = smov [#allocation2]  }
  0x11   :  { %v107_v21 = vadd.f32 %v73_v4, %v72_v3  ;;  %v66_v25 = vmul.f32 %v630_v16, %v630_v16  ;;  %v67_v26 = vmul.f32 %v635_v17, %v635_v17  ;;  %v47_v34 = vmul.f32 %v13_v40, %v13_v40  ;;  %s335_s20 = sshll.u32 %s402_s1, 4  ;;  %s336_s20 = int_to_ptr.vmem [resolvable:$true] %s335_s20 }
  0x12   :  { %126 = vadd.xlane.f32.xlu0 %v125_v43  ;;  %v104_v24 = vadd.f32 %v71_v10, %v70_v9  ;;  %v101_v27 = vadd.f32 %v69_v23, %v68_v22  ;;  %v46_v35 = vmul.f32 %v648_v33, %v648_v33  ;;  %s380_s21 = scalar_lea.vmem %s336_s20, 128  ;;  %p385_p1 = scmp.lt.s32.totalorder %s336_s20, %s336_s20 }
  0x13   :  { %123 = vadd.xlane.f32.xlu1 %v122_v46  ;;  %v98_v32 = vadd.f32 %v67_v26, %v66_v25  ;;  %v54_v36 = vrot.slane %v47_v34, 4  ;;  %p381_p0 = scmp.ne.s32.totalorder %s336_s20, %s380_s21  ;;  %p386_p2 = scmp.lt.s32.totalorder %s380_s21, %s380_s21 }
  0x14   :  { %v48_v37 = vrot.slane %v46_v35, 4 }
  0x15   :  { %v55_v43 = vadd.f32 %v54_v36, %v47_v34  ;;  %p387_p3 = por %p386_p2, %p385_p1 }
  0x16   :  { %120 = vadd.xlane.f32.xlu0 %v119_v53  ;;  %v49_v44 = vadd.f32 %v48_v37, %v46_v35 }
  0x17   :  { %117 = vadd.xlane.f32.xlu1 %v116_v56  ;;  %v56_v45 = vrot.slane %v55_v43, 2  ;;  %p388_p4 = pnand %p387_p3, %p381_p0 }
  0x18   :  { %v50_v46 = vrot.slane %v49_v44, 2 }
  0x19   :  { %v57_v47 = vadd.f32 %v56_v45, %v55_v43 }
  0x1a   :  { %114 = vadd.xlane.f32.xlu0 %v113_v63  ;;  %v51_v48 = vadd.f32 %v50_v46, %v49_v44 }
  0x1b   :  { %111 = vadd.xlane.f32.xlu1 %v110_v6  ;;  %v58_v53 = vrot.slane %v57_v47, 1 }
  0x1c   :  { %v52_v54 = vrot.slane %v51_v48, 1 }
  0x1d   :  { %v59_v55 = vadd.f32 %v58_v53, %v57_v47 }
  0x1e   :  { %108 = vadd.xlane.f32.xlu0 %v107_v21  ;;  %v53_v56 = vadd.f32 %v52_v54, %v51_v48 }
  0x1f   :  { %105 = vadd.xlane.f32.xlu1 %v104_v24  ;;  %344 = vrsqrt.f32 %v59_v55  ;;  %vm61_vm0 = vcmp.gt.f32.partialorder %v59_v55, 0.0 }
  0x20   :  { %346 = vrsqrt.f32 %v53_v56  ;;  %vm60_vm1 = vcmp.gt.f32.partialorder %v53_v56, 0.0 }
  0x22   :  { %102 = vadd.xlane.f32.xlu0 %v101_v27 }
  0x23   :  { %99 = vadd.xlane.f32.xlu1 %v98_v32 }
  0x2c   :  { %v345_v6 = vpop.eup %344 }
  0x2d   :  { %v347_v9 = vpop.eup %346  ;;  %v652_v24 = vsel %vm61_vm0, %v345_v6, 0.0 }
  0x2e   :  { %v654_v25 = vsel %vm60_vm1, %v347_v9, 0.0 }
  0x8f   :  { %v145_v57 = vpop.xlane.xlu0 %144 }
  0x90   :  { %348 = vrsqrt.f32 %v145_v57  ;;  %v139_v40 = vpop.xlane.xlu1 %138  ;;  %vm161_vm2 = vcmp.gt.f32.partialorder %v145_v57, 0.0 }
  0x91   :  { %350 = vrsqrt.f32 %v139_v40  ;;  %vm159_vm3 = vcmp.gt.f32.partialorder %v139_v40, 0.0 }
  0x93   :  { %v142_v58 = vpop.xlane.xlu0 %141 }
  0x94   :  { %352 = vrsqrt.f32 %v142_v58  ;;  %v136_v63 = vpop.xlane.xlu1 %135  ;;  %vm160_vm4 = vcmp.gt.f32.partialorder %v142_v58, 0.0 }
  0x95   :  { %354 = vrsqrt.f32 %v136_v63  ;;  %vm158_vm5 = vcmp.gt.f32.partialorder %v136_v63, 0.0 }
  0x97   :  { %v133_v3 = vpop.xlane.xlu0 %132 }
  0x98   :  { %356 = vrsqrt.f32 %v133_v3  ;;  %v130_v4 = vpop.xlane.xlu1 %129  ;;  %vm157_vm6 = vcmp.gt.f32.partialorder %v133_v3, 0.0 }
  0x99   :  { %358 = vrsqrt.f32 %v130_v4  ;;  %vm156_vm7 = vcmp.gt.f32.partialorder %v130_v4, 0.0 }
  0x9b   :  { %v127_v21 = vpop.xlane.xlu0 %126 }
  0x9c   :  { %360 = vrsqrt.f32 %v127_v21  ;;  %v124_v35 = vpop.xlane.xlu1 %123  ;;  %vm155_vm8 = vcmp.gt.f32.partialorder %v127_v21, 0.0 }
  0x9d   :  { %v349_v10 = vpop.eup %348  ;;  %362 = vrsqrt.f32 %v124_v35  ;;  %vm154_vm9 = vcmp.gt.f32.partialorder %v124_v35, 0.0 }
  0x9e   :  { %v351_v22 = vpop.eup %350  ;;  %v193_v23 = vsel %vm161_vm2, %v349_v10, 0.0 }
  0x9f   :  { %v225_v26 = vmul.f32 %v193_v23, %v426_v1  ;;  %v224_v27 = vmul.f32 %v193_v23, %v421_v0  ;;  %v191_v32 = vsel %vm159_vm3, %v351_v22, 0.0  ;;  %v121_v48 = vpop.xlane.xlu0 %120 }
  0xa0   :  { %v221_v45 = vmul.f32 %v191_v32, %v440_v5  ;;  %v220_v55 = vmul.f32 %v191_v32, %v431_v2  ;;  %364 = vrsqrt.f32 %v121_v48  ;;  %v118_v57 = vpop.xlane.xlu1 %117  ;;  %vm153_vm10 = vcmp.gt.f32.partialorder %v121_v48, 0.0 }
  0xa1   :  { %v353_v34 = vpop.eup %352  ;;  %v257_v36 = vmul.f32 %v225_v26, %v652_v24  ;;  %v256_v37 = vmul.f32 %v224_v27, %v654_v25  ;;  %366 = vrsqrt.f32 %v118_v57  ;;  %vm152_vm11 = vcmp.gt.f32.partialorder %v118_v57, 0.0 }
  0xa2   :  { %v355_v43 = vpop.eup %354  ;;  %v192_v44 = vsel %vm160_vm4, %v353_v34, 0.0  ;;  %v253_v5 = vmul.f32 %v221_v45, %v652_v24  ;;  %v252_v58 = vmul.f32 %v220_v55, %v654_v25 }
  0xa3   :  { %v222_v46 = vmul.f32 %v192_v44, %v447_v7  ;;  %v223_v47 = vmul.f32 %v192_v44, %v452_v8  ;;  %258 = vmatprep.subr.mxu0 %v257_v36  ;;  %v190_v0 = vsel %vm158_vm5, %v355_v43, 0.0  ;;  %v115_v6 = vpop.xlane.xlu0 %114 }
  0xa4   :  { %259 = vmatpush1.xpose.msra.mxu0 %v256_v37  ;;  %v219_v56 = vmul.f32 %v190_v0, %v468_v13  ;;  %v218_v40 = vmul.f32 %v190_v0, %v463_v12  ;;  %368 = vrsqrt.f32 %v115_v6  ;;  %v112_v23 = vpop.xlane.xlu1 %111  ;;  %vm151_vm12 = vcmp.gt.f32.partialorder %v115_v6, 0.0 }
  0xa5   :  { %v357_v1 = vpop.eup %356  ;;  %v255_v53 = vmul.f32 %v223_v47, %v652_v24  ;;  %v254_v54 = vmul.f32 %v222_v46, %v654_v25  ;;  %370 = vrsqrt.f32 %v112_v23  ;;  %vm150_vm13 = vcmp.gt.f32.partialorder %v112_v23, 0.0 }
  0xa6   :  { %v189_v7 = vsel %vm157_vm6, %v357_v1, 0.0  ;;  %v359_v8 = vpop.eup %358  ;;  %v251_v2 = vmul.f32 %v219_v56, %v652_v24  ;;  %v250_v4 = vmul.f32 %v218_v40, %v654_v25 }
  0xa7   :  { %260 = vmatprep.subr.mxu0 %v255_v53  ;;  %v217_v63 = vmul.f32 %v189_v7, %v482_v18  ;;  %v188_v13 = vsel %vm156_vm7, %v359_v8, 0.0  ;;  %v216_v9 = vmul.f32 %v189_v7, %v473_v14  ;;  %v109_v34 = vpop.xlane.xlu0 %108 }
  0xa8   :  { %261 = vmatpush1.xpose.msra.mxu0 %v254_v54  ;;  %v215_v10 = vmul.f32 %v188_v13, %v492_v20  ;;  %v214_v26 = vmul.f32 %v188_v13, %v487_v19  ;;  %372 = vrsqrt.f32 %v109_v34  ;;  %v106_v44 = vpop.xlane.xlu1 %105  ;;  %vm149_vm14 = vcmp.gt.f32.partialorder %v109_v34, 0.0 }
  0xa9   :  { %262 = vmatprep.subr.mxu0 %v253_v5  ;;  %v361_v3 = vpop.eup %360  ;;  %v249_v12 = vmul.f32 %v217_v63, %v652_v24  ;;  %v248_v21 = vmul.f32 %v216_v9, %v654_v25  ;;  %374 = vrsqrt.f32 %v106_v44  ;;  %vm148_vm15 = vcmp.gt.f32.partialorder %v106_v44, 0.0 }
  0xaa   :  { %v187_v22 = vsel %vm155_vm8, %v361_v3, 0.0  ;;  %v363_v18 = vpop.eup %362  ;;  %v247_v14 = vmul.f32 %v215_v10, %v652_v24  ;;  %v246_v35 = vmul.f32 %v214_v26, %v654_v25 }
  0xab   :  { %v213_v27 = vmul.f32 %v187_v22, %v510_v29  ;;  %v186_v32 = vsel %vm154_vm9, %v363_v18, 0.0  ;;  %v212_v36 = vmul.f32 %v187_v22, %v505_v28  ;;  %v103_v1 = vpop.xlane.xlu0 %102 }
  0xac   :  { %263 = vmatpush1.xpose.msra.mxu0 %v252_v58  ;;  %v211_v37 = vmul.f32 %v186_v32, %v520_v31  ;;  %v210_v45 = vmul.f32 %v186_v32, %v515_v30  ;;  %376 = vrsqrt.f32 %v103_v1  ;;  %v100_v56 = vpop.xlane.xlu1 %99  ;;  %vm147_vm0 = vcmp.gt.f32.partialorder %v103_v1, 0.0 }
  0xad   :  { %264 = vmatprep.subr.mxu0 %v251_v2  ;;  %v365_v20 = vpop.eup %364  ;;  %v245_v19 = vmul.f32 %v213_v27, %v652_v24  ;;  %v244_v46 = vmul.f32 %v212_v36, %v654_v25  ;;  %378 = vrsqrt.f32 %v100_v56  ;;  %vm146_vm1 = vcmp.gt.f32.partialorder %v100_v56, 0.0 }
  0xae   :  { %v185_v43 = vsel %vm153_vm10, %v365_v20, 0.0  ;;  %v367_v29 = vpop.eup %366  ;;  %v243_v28 = vmul.f32 %v211_v37, %v652_v24  ;;  %v242_v53 = vmul.f32 %v210_v45, %v654_v25 }
  0xaf   :  { %v209_v47 = vmul.f32 %v185_v43, %v538_v39  ;;  %v184_v0 = vsel %vm152_vm11, %v367_v29, 0.0  ;;  %v208_v48 = vmul.f32 %v185_v43, %v533_v38 }
  0xb0   :  { %265 = vmatpush1.xpose.msra.mxu0 %v250_v4  ;;  %v207_v54 = vmul.f32 %v184_v0, %v551_v42  ;;  %v206_v5 = vmul.f32 %v184_v0, %v546_v41 }
  0xb1   :  { %266 = vmatprep.subr.mxu0 %v249_v12  ;;  %v369_v31 = vpop.eup %368  ;;  %v241_v30 = vmul.f32 %v209_v47, %v652_v24  ;;  %v240_v7 = vmul.f32 %v208_v48, %v654_v25 }
  0xb2   :  { %v183_v55 = vsel %vm151_vm12, %v369_v31, 0.0  ;;  %v371_v39 = vpop.eup %370  ;;  %v239_v38 = vmul.f32 %v207_v54, %v652_v24  ;;  %v238_v58 = vmul.f32 %v206_v5, %v654_v25 }
  0xb3   :  { %v205_v8 = vmul.f32 %v183_v55, %v569_v50  ;;  %v182_v57 = vsel %vm150_vm13, %v371_v39, 0.0  ;;  %v204_v40 = vmul.f32 %v183_v55, %v564_v49 }
  0xb4   :  { %267 = vmatpush1.xpose.msra.mxu0 %v248_v21  ;;  %v203_v63 = vmul.f32 %v182_v57, %v579_v52  ;;  %v202_v50 = vmul.f32 %v182_v57, %v574_v51 }
  0xb5   :  { %268 = vmatprep.subr.mxu0 %v247_v14  ;;  %v373_v42 = vpop.eup %372  ;;  %v237_v41 = vmul.f32 %v205_v8, %v652_v24  ;;  %v236_v3 = vmul.f32 %v204_v40, %v654_v25 }
  0xb6   :  { %v181_v2 = vsel %vm149_vm14, %v373_v42, 0.0  ;;  %v375_v13 = vpop.eup %374  ;;  %v235_v9 = vmul.f32 %v203_v63, %v652_v24  ;;  %v234_v10 = vmul.f32 %v202_v50, %v654_v25 }
  0xb7   :  { %v201_v6 = vmul.f32 %v181_v2, %v597_v60  ;;  %v180_v49 = vsel %vm148_vm15, %v375_v13, 0.0  ;;  %v200_v52 = vmul.f32 %v181_v2, %v592_v59 }
  0xb8   :  { %269 = vmatpush1.xpose.msra.mxu0 %v246_v35  ;;  %v199_v12 = vmul.f32 %v180_v49, %v607_v62  ;;  %v198_v60 = vmul.f32 %v180_v49, %v602_v61 }
  0xb9   :  { %270 = vmatprep.subr.mxu0 %v245_v19  ;;  %v377_v4 = vpop.eup %376  ;;  %v233_v22 = vmul.f32 %v201_v6, %v652_v24  ;;  %v232_v23 = vmul.f32 %v200_v52, %v654_v25 }
  0xba   :  { %v179_v51 = vsel %vm147_vm0, %v377_v4, 0.0  ;;  %v379_v18 = vpop.eup %378  ;;  %v231_v21 = vmul.f32 %v199_v12, %v652_v24  ;;  %v230_v27 = vmul.f32 %v198_v60, %v654_v25 }
  0xbb   :  { %v197_v26 = vmul.f32 %v179_v51, %v625_v15  ;;  %v178_v59 = vsel %vm146_vm1, %v379_v18, 0.0  ;;  %v196_v62 = vmul.f32 %v179_v51, %v620_v11 }
  0xbc   :  { %271 = vmatpush1.xpose.msra.mxu0 %v244_v46  ;;  %v195_v14 = vmul.f32 %v178_v59, %v635_v17  ;;  %v194_v61 = vmul.f32 %v178_v59, %v630_v16 }
  0xbd   :  { %272 = vmatprep.subr.mxu0 %v243_v28  ;;  %v229_v32 = vmul.f32 %v197_v26, %v652_v24  ;;  %v228_v20 = vmul.f32 %v196_v62, %v654_v25 }
  0xbe   :  { %v227_v15 = vmul.f32 %v195_v14, %v652_v24  ;;  %v226_v34 = vmul.f32 %v194_v61, %v654_v25 }
  0xc0   :  { %273 = vmatpush1.xpose.msra.mxu0 %v242_v53 }
  0xc1   :  { %274 = vmatprep.subr.mxu0 %v241_v30 }
  0xc4   :  { %275 = vmatpush1.xpose.msra.mxu0 %v240_v7 }
  0xc5   :  { %276 = vmatprep.subr.mxu0 %v239_v38 }
  0xc8   :  { %277 = vmatpush1.xpose.msra.mxu0 %v238_v58 }
  0xc9   :  { %278 = vmatprep.subr.mxu0 %v237_v41 }
  0xcc   :  { %279 = vmatpush1.xpose.msra.mxu0 %v236_v3 }
  0xcd   :  { %280 = vmatprep.subr.mxu0 %v235_v9 }
  0xd0   :  { %281 = vmatpush1.xpose.msra.mxu0 %v234_v10 }
  0xd1   :  { %282 = vmatprep.subr.mxu0 %v233_v22 }
  0xd4   :  { %283 = vmatpush1.xpose.msra.mxu0 %v232_v23 }
  0xd5   :  { %284 = vmatprep.subr.mxu0 %v231_v21 }
  0xd8   :  { %285 = vmatpush1.xpose.msra.mxu0 %v230_v27 }
  0xd9   :  { %286 = vmatprep.subr.mxu0 %v229_v32 }
  0xdc   :  { %287 = vmatpush1.xpose.msra.mxu0 %v228_v20 }
  0xdd   :  { %288 = vmatprep.subr.mxu0 %v227_v15 }
  0xe0   :  { %289 = vmatpush1.xpose.msra.mxu0 %v226_v34 }
  0xe3   :  { %323 = vmatmul.mubr.f32.vlgmr.msra.gmra.mxu0 %v648_v33 }
 0x1a3   :  { %v324_v11 = vpop.f32.mrf.mxu0 }
 0x1a4   :  { %328 = vst [vmem:[#allocation2] sm:$0xff] %v324_v11 }
 0x1a5   :  { %v326_v17 = vpop.f32.mrf.mxu0 }
 0x1a6   :  { %391 = shalt.err (!%p388_p4)
}
 0x1a7   :  { %338 = dma.vmem_to_hbm [thread:$0]  %s336_s20, 128, %s726_s2, [#allocation3]  }
 0x1a8   :  { %400 = dma.done.wait [#allocation3], 128  }
 0x1a9   :  { %401 = vsyncadd [#allocation3], 4294967168 }
 0x1aa   :  { %342 = vsyncpa [#allocation3], 1 }

</bundles_post_ra>
